<compile_context>
chip_gen: v6e
topology: v6e:2x2x1
jax: 0.10.0
libtpu: 0.0.40
codegen_flags: <defaults>
</compile_context>

<pallas_src>
import functools

import jax
import jax.numpy as jnp
from jax.experimental import pallas as pl
from jax.experimental.pallas import tpu as pltpu


def _round_up(x, m):
    return (x + m - 1) // m * m


# ------------------------------ Pallas kernel --------------------------------
def _make_kernel(ohw, t_rows, n_classes):
    inv_ohw = 1.0 / float(ohw)
    needs_mask = (ohw % t_rows) != 0

    def kernel(p_ref, wc_ref, bc_ref, wf_ref, bf_ref, haz_ref, surv_ref, acc_ref):
        t = pl.program_id(1)

        @pl.when(t == 0)
        def _init():
            acc_ref[...] = jnp.zeros_like(acc_ref)

        # Conv stem as matmul on this row tile: (T_ROWS, CKKP)bf16 @ (CKKP, F)bf16 -> f32.
        act = jnp.dot(p_ref[...], wc_ref[...], preferred_element_type=jnp.float32)
        act = jnp.maximum(act + bc_ref[...], 0.0)

        if needs_mask:
            # Zero out rows that are padding past the true OH*OW extent (bias+ReLU would
            # otherwise pollute the mean pool).
            row = jax.lax.broadcasted_iota(jnp.int32, act.shape, 0) + t * t_rows
            act = jnp.where(row < ohw, act, 0.0)

        # Global-average-pool accumulation: sublane reduction into (1, F) scratch.
        acc_ref[...] += jnp.sum(act, axis=0, keepdims=True)

        @pl.when(t == pl.num_programs(1) - 1)
        def _finalize():
            feat = acc_ref[...] * inv_ohw                                   # (1, F)
            # Classifier (Dropout is identity at inference): Linear + Sigmoid.
            logits = jnp.dot(feat, wf_ref[...],
                             preferred_element_type=jnp.float32) + bf_ref[...]   # (1, C)

            # Numerically stable forms:
            #   softplus(z)       = max(z, 0) + log(1 + exp(-|z|))
            #   log(sigmoid(z))   = -softplus(-z) = logits - softplus(z)
            #   log(1-sigmoid(z)) = -softplus(z)
            sp_pos = jnp.maximum(logits, 0.0) + jnp.log(1.0 + jnp.exp(-jnp.abs(logits)))
            hazards = jnp.exp(logits - sp_pos)                              # sigmoid(z)
            haz_ref[...] = hazards

            # surv = cumprod(1 - hazards) = exp(cumsum(-softplus(z))); the cumsum over
            # n_classes is a tiny upper-triangular matmul built in-kernel (no extra DMA).
            c = n_classes
            row_i = jax.lax.broadcasted_iota(jnp.int32, (c, c), 0)
            col_i = jax.lax.broadcasted_iota(jnp.int32, (c, c), 1)
            tri = (row_i <= col_i).astype(jnp.float32)
            log_surv = jnp.dot(-sp_pos, tri, preferred_element_type=jnp.float32)
            surv_ref[...] = jnp.exp(log_surv)

    return kernel


# ------------------------------ JAX glue --------------------------------------
def _im2col(x, k, stride, pad):
    """x: (B, C, H, W) -> patches (B, OH*OW, C*k*k)."""
    xp = jnp.pad(x, ((0, 0), (0, 0), (pad, pad), (pad, pad)))
    B, C, Hp, Wp = xp.shape
    OH = (Hp - k) // stride + 1
    OW = (Wp - k) // stride + 1
    cols = []
    for i in range(k):
        for j in range(k):
            cols.append(xp[:, :, i:i + stride * OH:stride, j:j + stride * OW:stride])
    p = jnp.stack(cols, axis=2)                       # (B, C, k*k, OH, OW)
    p = p.transpose(0, 3, 4, 1, 2).reshape(B, OH * OW, C * k * k)
    return p, OH, OW


def init_params(key, in_ch=3, n_features=128, n_classes=4, k=3):
    k1, k2, k3, k4 = jax.random.split(key, 4)
    ckk = in_ch * k * k
    wc = jax.random.normal(k1, (n_features, in_ch, k, k), jnp.float32) / jnp.sqrt(ckk)
    bc = 0.01 * jax.random.normal(k2, (1, n_features), jnp.float32)
    wf = jax.random.normal(k3, (n_features, n_classes), jnp.float32) / jnp.sqrt(n_features)
    bf = 0.01 * jax.random.normal(k4, (1, n_classes), jnp.float32)
    return dict(wc=wc, bc=bc, wf=wf, bf=bf,
                in_ch=in_ch, n_features=n_features, n_classes=n_classes, k=k)


@jax.jit
def image_survival_forward(x, wc, bc, wf, bf):
    """x: (B, C, H, W) float32. Returns (hazards, surv), each (B, n_classes)."""
    B, Cin, _, _ = x.shape
    F = wc.shape[0]
    k = wc.shape[2]
    n_classes = wf.shape[1]

    patches, OH, OW = _im2col(x, k=k, stride=2, pad=1)      # (B, OHW, CKK) f32
    OHW = OH * OW
    CKK = Cin * k * k

    # Pad contraction (lane) dim to 32 for DMA alignment; pad rows to the row tile.
    CKKP = _round_up(CKK, 32)
    T_ROWS = min(512, _round_up(OHW, 16))                   # bf16 sublane packing = 16
    OHW_pad = _round_up(OHW, T_ROWS)
    num_t = OHW_pad // T_ROWS

    patches = jnp.pad(patches, ((0, 0), (0, OHW_pad - OHW), (0, CKKP - CKK)))
    patches = patches.astype(jnp.bfloat16)

    wc_mat = wc.reshape(F, CKK).T                           # (CKK, F)
    wc_mat = jnp.pad(wc_mat, ((0, CKKP - CKK), (0, 0))).astype(jnp.bfloat16)

    kernel = _make_kernel(ohw=OHW, t_rows=T_ROWS, n_classes=n_classes)

    hazards, surv = pl.pallas_call(
        kernel,
        grid=(B, num_t),
        in_specs=[
            # patch row tiles stream per (batch, row-tile); weights/biases stay resident.
            pl.BlockSpec((None, T_ROWS, CKKP), lambda b, t: (b, t, 0)),
            pl.BlockSpec((CKKP, F), lambda b, t: (0, 0)),
            pl.BlockSpec((1, F), lambda b, t: (0, 0)),
            pl.BlockSpec((F, n_classes), lambda b, t: (0, 0)),
            pl.BlockSpec((1, n_classes), lambda b, t: (0, 0)),
        ],
        out_specs=(
            pl.BlockSpec((None, 1, n_classes), lambda b, t: (b, 0, 0)),
            pl.BlockSpec((None, 1, n_classes), lambda b, t: (b, 0, 0)),
        ),
        out_shape=(
            jax.ShapeDtypeStruct((B, 1, n_classes), jnp.float32),
            jax.ShapeDtypeStruct((B, 1, n_classes), jnp.float32),
        ),
        scratch_shapes=[pltpu.VMEM((1, F), jnp.float32)],   # pooled-feature accumulator
        compiler_params=pltpu.CompilerParams(
            dimension_semantics=("parallel", "arbitrary"),
            vmem_limit_bytes=32 * 1024 * 1024,
        ),
    )(patches, wc_mat, bc, wf, bf)

    return hazards.reshape(B, n_classes), surv.reshape(B, n_classes)


# ------------------------------ main -------------------------------------------
if __name__ == "__main__":
    key = jax.random.PRNGKey(0)
    k_x, k_p = jax.random.split(key)

    B, C_in, H, W = 2, 3, 16, 16
    params = init_params(k_p, in_ch=C_in, n_features=128, n_classes=4, k=3)

    x = jax.random.normal(k_x, (B, C_in, H, W), jnp.float32)

    hazards, surv = image_survival_forward(
        x, params["wc"], params["bc"], params["wf"], params["bf"])
    jax.block_until_ready((hazards, surv))

    n_classes = params["n_classes"]
    assert hazards.shape == (B, n_classes)
    assert surv.shape == (B, n_classes)
    assert bool(jnp.all(jnp.isfinite(hazards))) and bool(jnp.all(jnp.isfinite(surv)))

    # Internal consistency: surv must equal cumprod(1 - hazards) of the kernel's hazards.
    surv_from_haz = jnp.cumprod(1.0 - hazards, axis=1)
    assert bool(jnp.allclose(surv, surv_from_haz, atol=1e-5))

    # Full f32 plain-JAX reference (loose tolerance: kernel matmuls use bf16 operands).
    patches_ref, OH, OW = _im2col(x, k=params["k"], stride=2, pad=1)
    wc_mat_ref = params["wc"].reshape(params["n_features"], -1).T
    act_ref = jnp.maximum(
        jnp.einsum("bpc,cf->bpf", patches_ref, wc_mat_ref) + params["bc"], 0.0)
    feat_ref = act_ref.mean(axis=1)
    logits_ref = feat_ref @ params["wf"] + params["bf"]
    haz_ref = jax.nn.sigmoid(logits_ref)
    surv_ref = jnp.cumprod(1.0 - haz_ref, axis=1)
    assert bool(jnp.allclose(hazards, haz_ref, atol=0.1))
    assert bool(jnp.allclose(surv, surv_ref, atol=0.1))

    print("KERNEL_OK")
</pallas_src>

<mosaic_0001>
module attributes {stable_mosaic.version = 11 : i64} {
  func.func @kernel(%arg0: i32, %arg1: i32, %arg2: memref<1x64x32xbf16, #tpu.memory_space<vmem>>, %arg3: memref<32x128xbf16, #tpu.memory_space<vmem>>, %arg4: memref<1x128xf32, #tpu.memory_space<vmem>>, %arg5: memref<128x4xf32, #tpu.memory_space<vmem>>, %arg6: memref<1x4xf32, #tpu.memory_space<vmem>>, %arg7: memref<1x1x4xf32, #tpu.memory_space<vmem>>, %arg8: memref<1x1x4xf32, #tpu.memory_space<vmem>>, %arg9: memref<1x128xf32, #tpu.memory_space<vmem>>) attributes {dimension_semantics = [#tpu.dimension_semantics<parallel>, #tpu.dimension_semantics<arbitrary>], iteration_bounds = array<i64: 2, 1>, scalar_prefetch = 0 : i64, scratch_operands = 1 : i64, tpu.core_type = #tpu.core_type<tc>, window_params = [{transform_indices = @transform_0, window_bounds = array<i64: 1, 64, 32>}, {pipeline_mode = #tpu.pipeline_mode<synchronous>, transform_indices = @transform_1, window_bounds = array<i64: 32, 128>}, {pipeline_mode = #tpu.pipeline_mode<synchronous>, transform_indices = @transform_2, window_bounds = array<i64: 1, 128>}, {pipeline_mode = #tpu.pipeline_mode<synchronous>, transform_indices = @transform_3, window_bounds = array<i64: 128, 4>}, {pipeline_mode = #tpu.pipeline_mode<synchronous>, transform_indices = @transform_4, window_bounds = array<i64: 1, 4>}, {transform_indices = @transform_5, window_bounds = array<i64: 1, 1, 4>}, {transform_indices = @transform_6, window_bounds = array<i64: 1, 1, 4>}]} {
    %c0_i32 = arith.constant 0 : i32
    %0 = arith.cmpi eq, %arg1, %c0_i32 : i32
    %1 = arith.extui %0 : i1 to i32
    %c0_i32_0 = arith.constant 0 : i32
    %2 = arith.cmpi ne, %1, %c0_i32_0 : i32
    scf.if %2 {
      %cst_15 = arith.constant 0.000000e+00 : f32
      %20 = vector.broadcast %cst_15 : f32 to vector<1x128xf32>
      %c0_16 = arith.constant 0 : index
      %c0_17 = arith.constant 0 : index
      %21 = vector.load %arg9[%c0_16, %c0_17] : memref<1x128xf32, #tpu.memory_space<vmem>>, vector<1x128xf32>
      tpu.vector_store %arg9[%c0_16, %c0_17], %20 {strides = array<i32>} : memref<1x128xf32, #tpu.memory_space<vmem>>, vector<1x128xf32>,
    } else {
    }
    %c0 = arith.constant 0 : index
    %c0_1 = arith.constant 0 : index
    %c0_2 = arith.constant 0 : index
    %3 = vector.load %arg2[%c0, %c0_1, %c0_2] : memref<1x64x32xbf16, #tpu.memory_space<vmem>>, vector<1x64x32xbf16>
    %4 = vector.shape_cast %3 : vector<1x64x32xbf16> to vector<64x32xbf16>
    %c0_3 = arith.constant 0 : index
    %c0_4 = arith.constant 0 : index
    %5 = vector.load %arg3[%c0_3, %c0_4] : memref<32x128xbf16, #tpu.memory_space<vmem>>, vector<32x128xbf16>
    %cst = arith.constant dense<0.000000e+00> : vector<64x128xf32>
    %6 = tpu.matmul %4, %5, %cst {dimension_numbers = #tpu.dot_dimension_numbers<[1], [0], [0], [1], [0, 0, 1, 1], [], []>} : vector<64x32xbf16>, vector<32x128xbf16>, vector<64x128xf32> -> vector<64x128xf32>
    %c0_5 = arith.constant 0 : index
    %c0_6 = arith.constant 0 : index
    %7 = vector.load %arg4[%c0_5, %c0_6] : memref<1x128xf32, #tpu.memory_space<vmem>>, vector<1x128xf32>
    %8 = vector.broadcast %7 : vector<1x128xf32> to vector<64x128xf32>
    %9 = arith.addf %6, %8 : vector<64x128xf32>
    %cst_7 = arith.constant 0.000000e+00 : f32
    %10 = vector.broadcast %cst_7 : f32 to vector<64x128xf32>
    %11 = arith.maximumf %9, %10 : vector<64x128xf32>
    %c0_8 = arith.constant 0 : index
    %c0_9 = arith.constant 0 : index
    %12 = vector.load %arg9[%c0_8, %c0_9] : memref<1x128xf32, #tpu.memory_space<vmem>>, vector<1x128xf32>
    %cst_10 = arith.constant dense<0.000000e+00> : vector<128xf32>
    %13 = vector.multi_reduction <add>, %11, %cst_10 [0] : vector<64x128xf32> to vector<128xf32>
    %14 = vector.shape_cast %13 : vector<128xf32> to vector<1x128xf32>
    %15 = arith.addf %12, %14 : vector<1x128xf32>
    %c0_11 = arith.constant 0 : index
    %c0_12 = arith.constant 0 : index
    %16 = vector.load %arg9[%c0_11, %c0_12] : memref<1x128xf32, #tpu.memory_space<vmem>>, vector<1x128xf32>
    tpu.vector_store %arg9[%c0_11, %c0_12], %15 {strides = array<i32>} : memref<1x128xf32, #tpu.memory_space<vmem>>, vector<1x128xf32>,
    %c0_i32_13 = arith.constant 0 : i32
    %17 = arith.cmpi eq, %arg1, %c0_i32_13 : i32
    %18 = arith.extui %17 : i1 to i32
    %c0_i32_14 = arith.constant 0 : i32
    %19 = arith.cmpi ne, %18, %c0_i32_14 : i32
    scf.if %19 {
      %c0_15 = arith.constant 0 : index
      %c0_16 = arith.constant 0 : index
      %20 = vector.load %arg9[%c0_15, %c0_16] : memref<1x128xf32, #tpu.memory_space<vmem>>, vector<1x128xf32>
      %cst_17 = arith.constant 1.562500e-02 : f32
      %21 = vector.broadcast %cst_17 : f32 to vector<1x128xf32>
      %22 = arith.mulf %20, %21 : vector<1x128xf32>
      %c0_18 = arith.constant 0 : index
      %c0_19 = arith.constant 0 : index
      %23 = vector.load %arg5[%c0_18, %c0_19] : memref<128x4xf32, #tpu.memory_space<vmem>>, vector<128x4xf32>
      %cst_20 = arith.constant dense<0.000000e+00> : vector<1x4xf32>
      %24 = tpu.matmul %22, %23, %cst_20 {dimension_numbers = #tpu.dot_dimension_numbers<[1], [0], [0], [1], [0, 0, 1, 1], [], []>} : vector<1x128xf32>, vector<128x4xf32>, vector<1x4xf32> -> vector<1x4xf32>
      %c0_21 = arith.constant 0 : index
      %c0_22 = arith.constant 0 : index
      %25 = vector.load %arg6[%c0_21, %c0_22] : memref<1x4xf32, #tpu.memory_space<vmem>>, vector<1x4xf32>
      %26 = arith.addf %24, %25 : vector<1x4xf32>
      %cst_23 = arith.constant 0.000000e+00 : f32
      %27 = vector.broadcast %cst_23 : f32 to vector<1x4xf32>
      %28 = arith.maximumf %26, %27 : vector<1x4xf32>
      %29 = math.absf %26 : vector<1x4xf32>
      %cst_24 = arith.constant 0.000000e+00 : f32
      %30 = vector.broadcast %cst_24 : f32 to vector<1x4xf32>
      %31 = arith.subf %30, %29 : vector<1x4xf32>
      %32 = math.exp %31 : vector<1x4xf32>
      %cst_25 = arith.constant 1.000000e+00 : f32
      %33 = vector.broadcast %cst_25 : f32 to vector<1x4xf32>
      %34 = arith.addf %33, %32 : vector<1x4xf32>
      %35 = math.log %34 : vector<1x4xf32>
      %36 = arith.addf %28, %35 : vector<1x4xf32>
      %37 = arith.subf %26, %36 : vector<1x4xf32>
      %38 = math.exp %37 : vector<1x4xf32>
      %c0_26 = arith.constant 0 : index
      %c0_27 = arith.constant 0 : index
      %c0_28 = arith.constant 0 : index
      %39 = vector.load %arg7[%c0_26, %c0_27, %c0_28] : memref<1x1x4xf32, #tpu.memory_space<vmem>>, vector<1x1x4xf32>
      %40 = vector.shape_cast %39 : vector<1x1x4xf32> to vector<1x4xf32>
      %41 = vector.shape_cast %38 : vector<1x4xf32> to vector<1x1x4xf32>
      tpu.vector_store %arg7[%c0_26, %c0_27, %c0_28], %41 {strides = array<i32>} : memref<1x1x4xf32, #tpu.memory_space<vmem>>, vector<1x1x4xf32>,
      %42 = tpu.iota {dimensions = array<i32: 0>} : vector<4x4xi32>
      %43 = tpu.iota {dimensions = array<i32: 1>} : vector<4x4xi32>
      %44 = arith.cmpi sle, %42, %43 : vector<4x4xi32>
      %45 = arith.extui %44 : vector<4x4xi1> to vector<4x4xi32>
      %46 = arith.sitofp %45 : vector<4x4xi32> to vector<4x4xf32>
      %cst_29 = arith.constant 0.000000e+00 : f32
      %47 = vector.broadcast %cst_29 : f32 to vector<1x4xf32>
      %48 = arith.subf %47, %36 : vector<1x4xf32>
      %cst_30 = arith.constant dense<0.000000e+00> : vector<1x4xf32>
      %49 = tpu.matmul %48, %46, %cst_30 {dimension_numbers = #tpu.dot_dimension_numbers<[1], [0], [0], [1], [0, 0, 1, 1], [], []>} : vector<1x4xf32>, vector<4x4xf32>, vector<1x4xf32> -> vector<1x4xf32>
      %50 = math.exp %49 : vector<1x4xf32>
      %c0_31 = arith.constant 0 : index
      %c0_32 = arith.constant 0 : index
      %c0_33 = arith.constant 0 : index
      %51 = vector.load %arg8[%c0_31, %c0_32, %c0_33] : memref<1x1x4xf32, #tpu.memory_space<vmem>>, vector<1x1x4xf32>
      %52 = vector.shape_cast %51 : vector<1x1x4xf32> to vector<1x4xf32>
      %53 = vector.shape_cast %50 : vector<1x4xf32> to vector<1x1x4xf32>
      tpu.vector_store %arg8[%c0_31, %c0_32, %c0_33], %53 {strides = array<i32>} : memref<1x1x4xf32, #tpu.memory_space<vmem>>, vector<1x1x4xf32>,
    } else {
    }
    return
  }
  func.func @transform_0(%arg0: i32, %arg1: i32) -> (i32, i32, i32) {
    %c0_i32 = arith.constant 0 : i32
    %c0_i32_0 = arith.constant 0 : i32
    return %arg0, %arg1, %c0_i32 : i32, i32, i32
  }
  func.func @transform_1(%arg0: i32, %arg1: i32) -> (i32, i32) {
    %c0_i32 = arith.constant 0 : i32
    %c0_i32_0 = arith.constant 0 : i32
    %c0_i32_1 = arith.constant 0 : i32
    return %c0_i32, %c0_i32_0 : i32, i32
  }
  func.func @transform_2(%arg0: i32, %arg1: i32) -> (i32, i32) {
    %c0_i32 = arith.constant 0 : i32
    %c0_i32_0 = arith.constant 0 : i32
    %c0_i32_1 = arith.constant 0 : i32
    return %c0_i32, %c0_i32_0 : i32, i32
  }
  func.func @transform_3(%arg0: i32, %arg1: i32) -> (i32, i32) {
    %c0_i32 = arith.constant 0 : i32
    %c0_i32_0 = arith.constant 0 : i32
    %c0_i32_1 = arith.constant 0 : i32
    return %c0_i32, %c0_i32_0 : i32, i32
  }
  func.func @transform_4(%arg0: i32, %arg1: i32) -> (i32, i32) {
    %c0_i32 = arith.constant 0 : i32
    %c0_i32_0 = arith.constant 0 : i32
    %c0_i32_1 = arith.constant 0 : i32
    return %c0_i32, %c0_i32_0 : i32, i32
  }
  func.func @transform_5(%arg0: i32, %arg1: i32) -> (i32, i32, i32) {
    %c0_i32 = arith.constant 0 : i32
    %c0_i32_0 = arith.constant 0 : i32
    %c0_i32_1 = arith.constant 0 : i32
    return %arg0, %c0_i32, %c0_i32_0 : i32, i32, i32
  }
  func.func @transform_6(%arg0: i32, %arg1: i32) -> (i32, i32, i32) {
    %c0_i32 = arith.constant 0 : i32
    %c0_i32_0 = arith.constant 0 : i32
    %c0_i32_1 = arith.constant 0 : i32
    return %arg0, %c0_i32, %c0_i32_0 : i32, i32, i32
  }
}

</mosaic_0001>

<bundles_post_ra>
// kernel: image_survival_forward.1
= control target key start
LH: loop header
LB: loop body
LE: loop exit
PB: predicated region body
PF: predicated region fallthrough
CT: control target
= control target key end

     0   :  { %12 = vsyncpa [#allocation4], 0  ;;  %s1307_s0 = inlined_call_operand.vmem [shape: bf16[2,64,32], index: 0, kind: input, shape index: {}]   ;;  %s1308_s1 = inlined_call_operand.vmem [shape: bf16[32,128], index: 1, kind: input, shape index: {}]   ;;  %s1309_s2 = inlined_call_operand.vmem [shape: f32[1,128], index: 2, kind: input, shape index: {}]   ;;  %s1310_s3 = inlined_call_operand.vmem [shape: f32[128,4], index: 3, kind: input, shape index: {}]   ;;  %s1311_s4 = inlined_call_operand.vmem [shape: f32[1,4], index: 4, kind: input, shape index: {}]   ;;  %s1312_s5 = inlined_call_operand.hbm [shape: f32[2,1,4], index: 5, kind: output, shape index: {0}]   ;;  %s1313_s6 = inlined_call_operand.hbm [shape: f32[2,1,4], index: 6, kind: output, shape index: {1}]  }
   0x1   :  { %14 = vsyncpa [#allocation4 + $0x1], 0 }
   0x2   :  { %15 = vsyncpa [#allocation6], 0 }
   0x3   :  { %17 = vsyncpa [#allocation6 + $0x1], 0  ;;  %s1094_s21 = smov 0   ;;  %s1096_s22 = smov 0  }
   0x4   :  { %s1098_s23 = smov 0   ;;  %s1100_s24 = smov 0  }
   0x5   :  { %s1102_s25 = smov 0   ;;  %s1104_s26 = smov 0  }
   0x6 LB: > { %s768_s27 = sadd.s32 4294967295, %s1053_s26   ;;  %s769_s28 = sadd.s32 4294967294, %s1053_s26   ;;  %s1053_s26 = sphi %s1104_s26, %s23_s26   ;;  %s1049_s25 = sphi %s1102_s25, %s1322_s25   ;;  %s1045_s24 = sphi %s1100_s24, %s1321_s24   ;;  %s1041_s23 = sphi %s1098_s23, %s1320_s23   ;;  %s1037_s22 = sphi %s1096_s22, %s1319_s22   ;;  %s1033_s21 = sphi %s1094_s21, %s1318_s21  }
   0x7   : > { %s35_s29 = sadd.s32 1, %s1049_s25  ;;  %s154_s30 = sadd.s32 1, %s1041_s23 }
   0x8   : > { %p37_p0 = scmp.ge.s32.totalorder %s35_s29, 2  ;;  %p164_p1 = scmp.ne.s32.totalorder %s1041_s23, %s1037_s22 }
   0x9   : > { %p165_p2 = scmp.eq.s32.totalorder %s768_s27, 1  ;;  %p170_p3 = scmp.ne.s32.totalorder %s1037_s22, %s1033_s21 }
   0xa   : > { %s1324_s29 = smov (%p37_p0, %s35_s29), 0  ;;  %p171_p5 = scmp.eq.s32.totalorder %s769_s28, 1 }
   0xb   : > { %p1134_p4 = por %p165_p2, %p164_p1  ;;  %s151_s8 = ssub.s32 %s1049_s25, %s1324_s29 }
   0xc   : > { %p772_p6 = scmp.ge.s32.totalorder %s1053_s26, 1  ;;  %p152_p7 = scmp.eq.s32.totalorder %s151_s8, 0 }
   0xd   : > { %p1141_p8 = por %p171_p5, %p170_p3  ;;  %p240_p9 = scmp.lt.s32.totalorder %s1053_s26, 3 }
   0xe   : > { %s1147_s10 = scalar_select %p152_p7, %s1041_s23, %s154_s30  }
   0xf   : > { %p241_p10 = pnand %p772_p6, %p240_p9 }
  0x10   : > { %p278_p11 = scmp.lt.s32.totalorder (!%p241_p10), %s1045_s24, 1  ;;  %s1236_s14 = sand.u32 (!%p241_p10), 1, %s1037_s22  }
  0x11   : > { %244 = sbr.rel (%p241_p10) target bundleno = 731 (0x2db), region = 40  ;;  %s642_s27 = scalar_lea.sflag (!%p241_p10), [#allocation4], %s1236_s14 }
  0x12   : > { %s1057_s30 = smov (!%p241_p10), [#allocation3]  }
  0x13   : > { %s951_s8 = sshll.u32 (!%p241_p10), %s1057_s30, 4  ;;  %s952_s8 = int_to_ptr.vmem [resolvable:$false] %s951_s8 }
  0x14   : > { %s953_s11 = scalar_lea.vmem (!%p241_p10), %s952_s8, 32 }
  0x16   : > { %v933_v0 = vld [vmem:[%s1308_s1 + $0x8] sm:$0xff]   ;;  %v934_v1 = vld [vmem:[%s1308_s1] sm:$0xff]   ;;  %s279_s15 = scalar_select %p278_p11, %s1045_s24, 1  ;;  %vm344_vm0 = vcmask 261120   ;;  %v1055_v6 = vmov 0.0   ;;  %v466_v7 = vld [vmem:[%s1310_s3 + $0x78] sm:$0xff] }
  0x17   : > { %819 = vmatprep.subr.bf16.mxu0 %v933_v0  ;;  %292 = vst [vmem:[#allocation2] sm:$0x1] %v1055_v6  ;;  %831 = vmatprep.subr.mxu1 %v1055_v6  ;;  %v465_v8 = vld [vmem:[%s1310_s3 + $0x70] sm:$0xff]  ;;  %v464_v9 = vld [vmem:[%s1310_s3 + $0x68] sm:$0xff]  ;;  %v463_v10 = vld [vmem:[%s1310_s3 + $0x60] sm:$0xff]  ;;  %vm1056_vm1 = vmmov 0  }
  0x18   : > { %820 = vmatpush3.bf16.msra.mxu0 %v933_v0  ;;  %s793_s16 = sshll.u32 %s279_s15, 5  ;;  %832 = vmatpush3.msra.mxu1 %v466_v7  ;;  %v462_v11 = vld [vmem:[%s1310_s3 + $0x58] sm:$0xff]  ;;  %v461_v12 = vld [vmem:[%s1310_s3 + $0x50] sm:$0xff]  ;;  %v460_v13 = vld [vmem:[%s1310_s3 + $0x48] sm:$0xff]  ;;  %vm564_vm3 = vcmask 1043456   ;;  %vm560_vm4 = vcmask 31744  }
  0x19   : > { %821 = vmatprep.subr.bf16.mxu0 %v934_v1  ;;  %s285_s19 = scalar_lea.vmem %s1307_s0, %s793_s16  ;;  %833 = vmatprep.subr.mxu1 %v1055_v6  ;;  %v459_v14 = vld [vmem:[%s1310_s3 + $0x40] sm:$0xff]  ;;  %v458_v15 = vld [vmem:[%s1310_s3 + $0x38] sm:$0xff]  ;;  %v457_v16 = vld [vmem:[%s1310_s3 + $0x30] sm:$0xff]  ;;  %vm550_vm5 = vcmask 24576   ;;  %s270_s15 = scalar_lea.vmem [#allocation3], %s1236_s14 }
  0x1a   : > { %v935_v2 = vld [vmem:[%s285_s19] sm:$0xff]   ;;  %v936_v3 = vld [vmem:[%s285_s19 + $0x8] sm:$0xff]   ;;  %v937_v4 = vld [vmem:[%s285_s19 + $0x10] sm:$0xff]   ;;  %834 = vmatpush3.msra.mxu1 %v465_v8  ;;  %863 = vmatprep.mubr.msk.f32.mxu1 %vm1056_vm1, %v1055_v6  ;;  %s1314_s16 = sshll.u32 %s1045_s24, 4  ;;  %s658_s20 = sshll.u32 %s270_s15, 4  ;;  %s659_s20 = int_to_ptr.vmem [resolvable:$true] %s658_s20 }
  0x1b   : > { %823 = vmatprep.mubr.msk.bf16.mxu0 %vm344_vm0, %v935_v2  ;;  %v938_v5 = vld [vmem:[%s285_s19 + $0x18] sm:$0xff]   ;;  %835 = vmatprep.subr.mxu1 %v1055_v6  ;;  %v456_v17 = vld [vmem:[%s1310_s3 + $0x28] sm:$0xff]  ;;  %v455_v18 = vld [vmem:[%s1310_s3 + $0x20] sm:$0xff]  ;;  %s656_s19 = scalar_lea.hbm %s1312_s5, %s1314_s16  ;;  %s947_s28 = scalar_lea.vmem %s659_s20, 16 }
  0x1c   : > { %822 = vmatpush3.bf16.msra.mxu0 %v934_v1  ;;  %836 = vmatpush3.msra.mxu1 %v464_v9  ;;  %v454_v19 = vld [vmem:[%s1310_s3 + $0x18] sm:$0xff]  ;;  %v453_v20 = vld [vmem:[%s1310_s3 + $0x10] sm:$0xff]  ;;  %v452_v21 = vld [vmem:[%s1310_s3 + $0x8] sm:$0xff]  ;;  %v552_v1 = vlaneseq  ;;  %p948_p12 = scmp.ne.s32.totalorder %s659_s20, %s947_s28  ;;  %p954_p1 = scmp.lt.s32.totalorder %s659_s20, %s952_s8 }
  0x1d   : > { %866 = vmatprep.subr.mxu0 %v1055_v6  ;;  %837 = vmatprep.subr.mxu1 %v1055_v6  ;;  %v451_v22 = vld [vmem:[%s1310_s3] sm:$0xff]  ;;  %p955_p2 = scmp.lt.s32.totalorder %s953_s11, %s947_s28 }
  0x1e   : > { %838 = vmatpush3.msra.mxu1 %v463_v10  ;;  %v775_v25 = vld [vmem:[%s1309_s2] ss:$0 sm:$0xff]  ;;  %v553_v2 = vshrl.u32 %v552_v1, 7  ;;  %p949_p13 = pnand %p948_p12, %p1134_p4 }
  0x1f   : > { %824 = vmatmul.mubr.msk.bf16.vlgmr.msra.gmra.mxu0 %vm344_vm0, %v936_v3  ;;  %839 = vmatprep.subr.mxu1 %v1055_v6  ;;  %v430_v60 = vld [vmem:[#allocation2] sm:$0x1]  ;;  %v555_v3 = vand.u32 127, %v552_v1  ;;  %p956_p3 = por %p955_p2, %p954_p1 }
  0x20   : > { %827 = vmatprep.mubr.msk.bf16.mxu0 %vm344_vm0, %v937_v4  ;;  %840 = vmatpush3.msra.mxu1 %v462_v11  ;;  %p950_p0 = pneg %p949_p13 }
  0x21   : > { %841 = vmatprep.subr.mxu1 %v1055_v6  ;;  %vm556_vm2 = vcmp.le.s32.totalorder %v553_v2, %v555_v3 }
  0x22   : > { %842 = vmatpush3.msra.mxu1 %v461_v12  ;;  %v786_v4 = vsel %vm556_vm2, 1.0, %v1055_v6  ;;  %p957_p5 = pnand %p956_p3, %p950_p0 }
  0x23   : > { %843 = vmatprep.subr.mxu1 %v1055_v6  ;;  %867 = vmatpush3.msk.msra.mxu0 %vm564_vm3, %v786_v4 }
  0x24   : > { %844 = vmatpush3.msra.mxu1 %v460_v13 }
  0x25   : > { %845 = vmatprep.subr.mxu1 %v1055_v6 }
  0x26   : > { %846 = vmatpush3.msra.mxu1 %v459_v14 }
  0x27   : > { %828 = vmatmul.mubr.msk.bf16.gmra.mxu0 %vm344_vm0, %v938_v5  ;;  %847 = vmatprep.subr.mxu1 %v1055_v6  ;;  %v467_v5 = vld [vmem:[%s1311_s4] sm:$0x1] }
  0x28   : > { %848 = vmatpush3.msra.mxu1 %v458_v15  ;;  %868 = vmatprep.mubr.msk.f32.mxu0 %vm1056_vm1, %v1055_v6 }
  0x29   : > { %849 = vmatprep.subr.mxu1 %v1055_v6 }
  0x2a   : > { %850 = vmatpush3.msra.mxu1 %v457_v16 }
  0x2b   : > { %851 = vmatprep.subr.mxu1 %v1055_v6 }
  0x2c   : > { %852 = vmatpush3.msra.mxu1 %v456_v17 }
  0x2d   : > { %853 = vmatprep.subr.mxu1 %v1055_v6 }
  0x2e   : > { %854 = vmatpush3.msra.mxu1 %v455_v18 }
  0x2f   : > { %855 = vmatprep.subr.mxu1 %v1055_v6 }
  0x30   : > { %856 = vmatpush3.msra.mxu1 %v454_v19 }
  0x31   : > { %857 = vmatprep.subr.mxu1 %v1055_v6 }
  0x32   : > { %858 = vmatpush3.msra.mxu1 %v453_v20 }
  0x33   : > { %859 = vmatprep.subr.mxu1 %v1055_v6 }
  0x34   : > { %860 = vmatpush3.msra.mxu1 %v452_v21 }
  0x35   : > { %861 = vmatprep.subr.mxu1 %v1055_v6 }
  0x36   : > { %862 = vmatpush3.msra.mxu1 %v451_v22 }
  0xdf   : > { %v825_v23 = vpop.f32.mrf.mxu0 }
  0xe0   : > { %v400_v29 = vadd.f32 %v825_v23, %v775_v25 }
  0xe1   : > { %v391_v24 = vpop.f32.mrf.mxu0 }
  0xe2   : > { %v392_v27 = vadd.f32 %v775_v25, %v391_v24  ;;  %v424_v36 = vmax.f32 %v400_v29, 0.0 }
  0xe3   : > { %v826_v26 = vpop.f32.mrf.mxu0 }
  0xe4   : > { %v422_v32 = vmax.f32 %v392_v27, 0.0  ;;  %v403_v33 = vadd.f32 %v826_v26, %v775_v25 }
  0xe5   : > { %v394_v28 = vpop.f32.mrf.mxu0 }
  0xe6   : > { %v395_v30 = vadd.f32 %v775_v25, %v394_v28  ;;  %v425_v40 = vmax.f32 %v403_v33, 0.0 }
  0xe7   : > { %v829_v31 = vpop.f32.mrf.mxu0 }
  0xe8   : > { %v423_v34 = vmax.f32 %v395_v30, 0.0  ;;  %v416_v43 = vadd.f32 %v829_v31, %v775_v25 }
  0xe9   : > { %v407_v35 = vpop.f32.mrf.mxu0 }
  0xea   : > { %v431_v37 = vadd.f32 %v423_v34, %v422_v32  ;;  %v408_v38 = vadd.f32 %v775_v25, %v407_v35  ;;  %v428_v50 = vmax.f32 %v416_v43, 0.0 }
  0xeb   : > { %v830_v39 = vpop.f32.mrf.mxu0 }
  0xec   : > { %v432_v41 = vadd.f32 %v431_v37, %v424_v36  ;;  %v426_v44 = vmax.f32 %v408_v38, 0.0  ;;  %v419_v48 = vadd.f32 %v830_v39, %v775_v25 }
  0xed   : > { %v410_v42 = vpop.f32.mrf.mxu0 }
  0xee   : > { %v433_v45 = vadd.f32 %v432_v41, %v425_v40  ;;  %v411_v46 = vadd.f32 %v775_v25, %v410_v42  ;;  %v429_v52 = vmax.f32 %v419_v48, 0.0 }
  0xf0   : > { %v434_v47 = vadd.f32 %v433_v45, %v426_v44  ;;  %v427_v49 = vmax.f32 %v411_v46, 0.0 }
  0xf2   : > { %v435_v51 = vadd.f32 %v434_v47, %v427_v49 }
  0xf4   : > { %v436_v53 = vadd.f32 %v435_v51, %v428_v50 }
  0xf6   : > { %v437_v54 = vadd.f32 %v436_v53, %v429_v52 }
  0xf8   : > { %v438_v55 = vrot.slane %v437_v54, 4 }
  0xfa   : > { %v439_v56 = vadd.f32 %v438_v55, %v437_v54 }
  0xfc   : > { %v440_v57 = vrot.slane %v439_v56, 2 }
  0xfe   : > { %v441_v58 = vadd.f32 %v440_v57, %v439_v56 }
 0x100   : > { %v442_v59 = vrot.slane %v441_v58, 1 }
 0x102   : > { %v443_v61 = vadd.f32 %v442_v59, %v441_v58 }
 0x104   : > { %v444_v62 = vadd.f32 %v443_v61, %v430_v60 }
 0x106   : > { %445 = vst [vmem:[#allocation2] sm:$0x1] %v444_v62 }
 0x10d   : > { %v449_v63 = vld [vmem:[#allocation2] sm:$0x1] }
 0x10e   : > { %v450_v0 = vmul.f32 0.015625, %v449_v63 }
 0x110   : > { %864 = vmatmul.mubr.f32.vlgmr.msra.gmra.mxu1 %v450_v0 }
 0x1d0   : > { %v534_v7 = vpop.f32.mrf.mxu1 }
 0x1d1   : > { %v535_v8 = vadd.f32 %v534_v7, %v467_v5 }
 0x1d2   : > { %v865_v9 = vpop.f32.mrf.mxu1 }
 0x1d3   : > { %v539_v10 = vand.u32 2147483647, %v535_v8  ;;  %v538_v6 = vmax.f32 %v535_v8, 0.0 }
 0x1d5   : > { %v540_v11 = vsub.f32 0.0, %v539_v10 }
 0x1d7   : > { %v541_v12 = vmul.f32 1.442695, %v540_v11 }
 0x1d9   : > { %939 = vpow2.f32 %v541_v12 }
 0x1e6   : > { %v940_v13 = vpop.eup %939 }
 0x1e7   : > { %v543_v14 = vadd.f32 1.0, %v940_v13 }
 0x1e9   : > { %941 = vlog2.f32 %v543_v14 }
 0x1f6   : > { %v942_v15 = vpop.eup %941 }
 0x1f7   : > { %v545_v16 = vmul.f32 0.6931472, %v942_v15 }
 0x1f9   : > { %v546_v17 = vadd.f32 %v545_v16, %v538_v6 }
 0x1fb   : > { %v547_v18 = vsub.f32 %v535_v8, %v546_v17  ;;  %v559_v19 = vsub.f32 0.0, %v546_v17 }
 0x1fd   : > { %v548_v20 = vmul.f32 1.442695, %v547_v18  ;;  %869 = vmatmul.mubr.msk.f32.vlgmr.msra.gmra.mxu0 %vm560_vm4, %v559_v19 }
 0x1ff   : > { %943 = vpow2.f32 %v548_v20 }
 0x20c   : > { %v944_v21 = vpop.eup %943 }
 0x20d   : > { %551 = vst.msk [vmem:[%s270_s15] sm:$0x1] %vm550_vm5, %v944_v21 }
 0x20e   : > { %960 = shalt.err (!%p957_p5)
}
 0x20f   : > { %s961_s12 = scalar_lea.hbm %s656_s19, 16  ;;  %s965_s17 = scalar_lea.hbm %s1312_s5, 32 }
 0x210   : > { %p962_p6 = scmp.ne.s32.totalorder %s656_s19, %s961_s12  ;;  %p966_p10 = scmp.lt.s32.totalorder %s656_s19, %s1312_s5 }
 0x211   : > { %p967_p11 = scmp.lt.s32.totalorder %s965_s17, %s961_s12 }
 0x212   : > { %p963_p7 = pnand %p962_p6, %p1134_p4 }
 0x213   : > { %p968_p12 = por %p967_p11, %p966_p10 }
 0x214   : > { %p964_p9 = pneg %p963_p7 }
 0x216   : > { %p969_p13 = pnand %p968_p12, %p964_p9 }
 0x218   : > { %972 = shalt.err (!%p969_p13)
}
 0x219   : > { %871 = dma.vmem_to_hbm [thread:$0]  (%p1134_p4), %s659_s20, 16, %s656_s19, %s642_s27  }
 0x21a   : > { %s276_s28 = scalar_lea.vmem [#allocation5], %s1236_s14  ;;  %s1317_s8 = sshll.u32 %s1045_s24, 4 }
 0x21b   : > { %s671_s30 = sshll.u32 %s276_s28, 4  ;;  %s1265_s12 = scalar_lea.hbm %s1313_s6, %s1317_s8  ;;  %s672_s30 = int_to_ptr.vmem [resolvable:$true] %s671_s30 }
 0x21c   : > { %s646_s13 = scalar_lea.sflag [#allocation6], %s1236_s14  ;;  %s973_s15 = scalar_lea.vmem %s672_s30, 16 }
 0x21d   : > { %p974_p0 = scmp.ne.s32.totalorder %s672_s30, %s973_s15  ;;  %s1058_s19 = smov [#allocation5]  }
 0x21e   : > { %s977_s20 = sshll.u32 %s1058_s19, 4  ;;  %s978_s20 = int_to_ptr.vmem [resolvable:$false] %s977_s20 }
 0x21f   : > { %p975_p1 = pnand %p974_p0, %p1134_p4  ;;  %s979_s27 = scalar_lea.vmem %s978_s20, 32 }
 0x220   : > { %p980_p3 = scmp.lt.s32.totalorder %s672_s30, %s978_s20  ;;  %p981_p5 = scmp.lt.s32.totalorder %s979_s27, %s973_s15 }
 0x221   : > { %p976_p2 = pneg %p975_p1 }
 0x222   : > { %p982_p6 = por %p981_p5, %p980_p3 }
 0x224   : > { %p983_p7 = pnand %p982_p6, %p976_p2 }
 0x2bd   : > { %v634_v22 = vpop.f32.mrf.mxu0 }
 0x2be   : > { %v638_v23 = vmul.f32 1.442695, %v634_v22 }
 0x2bf   : > { %v870_v24 = vpop.f32.mrf.mxu0 }
 0x2c0   : > { %945 = vpow2.f32 %v638_v23 }
 0x2cd   : > { %v946_v25 = vpop.eup %945 }
 0x2ce   : > { %640 = vst.msk [vmem:[%s276_s28] sm:$0x1] %vm550_vm5, %v946_v25 }
 0x2cf   : > { %986 = shalt.err (!%p983_p7)
}
 0x2d0   : > { %s987_s24 = scalar_lea.hbm %s1265_s12, 16  ;;  %s991_s18 = scalar_lea.hbm %s1313_s6, 32 }
 0x2d1   : > { %p988_p9 = scmp.ne.s32.totalorder %s1265_s12, %s987_s24  ;;  %p992_p12 = scmp.lt.s32.totalorder %s1265_s12, %s1313_s6 }
 0x2d2   : > { %p993_p13 = scmp.lt.s32.totalorder %s991_s18, %s987_s24 }
 0x2d3   : > { %p989_p10 = pnand %p988_p9, %p1134_p4 }
 0x2d4   : > { %p994_p0 = por %p993_p13, %p992_p12 }
 0x2d5   : > { %p990_p11 = pneg %p989_p10 }
 0x2d7   : > { %p995_p1 = pnand %p994_p0, %p990_p11 }
 0x2d9   : > { %998 = shalt.err (!%p995_p1)
}
 0x2da   : > { %872 = dma.vmem_to_hbm [thread:$0]  (%p1134_p4), %s672_s30, 16, %s1265_s12, %s646_s13  }
 0x2db PF: > { %p882_p2 = scmp.ge.s32.totalorder %s1053_s26, 2  ;;  %s683_s16 = sand.u32 1, %s1033_s21  }
 0x2dc   : > { %s684_s11 = scalar_lea.sflag [#allocation4], %s683_s16 }
 0x2dd   : > { %p876_p3 = pnand %p882_p2, %p1141_p8 }
 0x2df   : > { %p877_p5 = pneg %p876_p3 }
 0x2e1   : > { %1024 = dma.done.wait (%p877_p5), %s684_s11, 16  }
 0x2e2   : > { %1026 = vsyncadd (%p877_p5), %s684_s11, 4294967280  ;;  %s692_s15 = scalar_lea.sflag [#allocation6], %s683_s16 }
 0x2e3   : > { %1028 = dma.done.wait (%p877_p5), %s692_s15, 16  }
 0x2e4   : > { %1030 = vsyncadd (%p877_p5), %s692_s15, 4294967280  ;;  %s23_s26 = sadd.s32 1, %s1053_s26   ;;  %s1318_s21 = smov %s1037_s22 }
 0x2e5   : > { %p20_p6 = scmp.ge.s32.totalorder %s23_s26, 4   ;;  %s1319_s22 = smov %s1041_s23 }
 0x2e6   : > { %s1320_s23 = smov %s1147_s10  ;;  %s1321_s24 = smov %s1049_s25 }
 0x2e7   : > { %s1322_s25 = smov %s1324_s29  ;;  %22 = sbr.rel (!%p20_p6) target bundleno = 6 (0x6), region = 100 }
 0x2ec   :  { %696 = vsyncpa [#allocation4], 1 }
 0x2ed   :  { %698 = vsyncpa [#allocation4 + $0x1], 1 }
 0x2ee   :  { %699 = vsyncpa [#allocation6], 1 }
 0x2ef   :  { %701 = vsyncpa [#allocation6 + $0x1], 1 }

</bundles_post_ra>
